<compile_context>
chip_gen: v7x
topology: tpu7x:2x2x1
jax: 0.10.0
libtpu: 0.0.40
codegen_flags: <defaults>
</compile_context>

<pallas_src>
import math

import numpy as np
import jax
import jax.numpy as jnp
from jax import lax
from jax.experimental import pallas as pl
from jax.experimental.pallas import tpu as pltpu


# --------------------------------------------------------------------------- helpers
def _ceil_div(a, b):
    return -(-a // b)


def _padbytes(shape, itemsize):
    """VMEM bytes of one buffer holding `shape`, incl. (8,128) tile padding."""
    shape = tuple(int(d) for d in shape)
    if len(shape) == 1:
        shape = (1,) + shape
    lead = 1
    for d in shape[:-2]:
        lead *= d
    rows = _ceil_div(shape[-2], 8) * 8
    lanes = _ceil_div(shape[-1], 128) * 128
    return lead * rows * lanes * int(itemsize)


def _vmem_limit(in_block_bytes, out_block_bytes, f32_work_bytes):
    # 2x pipeline buffers per input/output + in-kernel f32 working set + slack.
    need = 2 * in_block_bytes + 2 * out_block_bytes + f32_work_bytes + (2 << 20)
    return int(min(max(need, 16 << 20), 31 << 20))        # v7x-safe (< 32 MiB scoped)


def _choose_lanes(group):
    """Smallest multiple of 128 divisible by `group`, scaled up to >= 512 lanes."""
    base = 128 * group // math.gcd(128, group)
    return base * max(1, 512 // base)


def _pick_tile_n(N, per_lane_f32, tile_n=None):
    if tile_n is not None:
        t = min(int(tile_n), N)
        if t < N:
            t = (t // 128) * 128
            if t <= 0:
                t = min(128, N)
        return t
    budget = 12 << 20
    max_tn = max(128, budget // max(per_lane_f32, 1))
    if N <= max_tn:
        return N
    return int(max(128, min((max_tn // 128) * 128, 8192)))


def _dot_bf16x2(x_f32, mat_bf16):
    """x @ mat on the MXU, ~f32-exact via a hi/lo bf16 split of x (mat is 0/1)."""
    hi = x_f32.astype(jnp.bfloat16)
    lo = (x_f32 - hi.astype(jnp.float32)).astype(jnp.bfloat16)
    return (jnp.dot(hi, mat_bf16, preferred_element_type=jnp.float32)
            + jnp.dot(lo, mat_bf16, preferred_element_type=jnp.float32))


# --------------------------------------------------------------------------- BCE (flat, lane-dense)
def _make_bce_flat_kernel(*, lanes, total, num_classes, has_graphs, labels_only, half):
    inv = 1.0 / float(num_classes - 1)

    def kernel(*refs):
        it = iter(refs)
        pred_ref = next(it)
        lab_ref = next(it)
        tgt_ref = next(it) if not labels_only else None
        cls_ref = next(it)
        elab_ref = next(it)
        etgt_ref = next(it) if (has_graphs and not labels_only) else None
        sel_ref = next(it) if has_graphs else None
        out_ref = next(it)

        if has_graphs:
            blk = pl.program_id(0) * half + pl.program_id(1)

            @pl.when(pl.program_id(1) == 0)
            def _init():
                out_ref[...] = jnp.zeros_like(out_ref)
        else:
            blk = pl.program_id(0)

        pred = pred_ref[...].astype(jnp.float32)                       # (tr, lanes)
        # per-lane target class via a tiny static expand matmul (idle MXU)
        lab_exp = _dot_bf16x2(lab_ref[...].astype(jnp.float32), elab_ref[...])
        hit = cls_ref[...] == lab_exp                                  # one-hot / argmax mask
        scale = jnp.where(hit, 1.0, inv)

        if labels_only:
            # target is exactly one-hot -> single log per element (EUP halved)
            chosen = jnp.where(hit, pred, 1.0 - pred)
            loss = -jnp.maximum(jnp.log(chosen), -100.0) * scale
        else:
            if has_graphs:
                tgt = _dot_bf16x2(tgt_ref[...].astype(jnp.float32), etgt_ref[...])
            else:
                tgt = tgt_ref[...].astype(jnp.float32)
            log_p = jnp.maximum(jnp.log(pred), -100.0)
            log_q = jnp.maximum(jnp.log(1.0 - pred), -100.0)
            loss = -(tgt * log_p + (1.0 - tgt) * log_q) * scale

        # mask padded / out-of-range flat elements (tail blocks, clamped blocks)
        tr = loss.shape[0]
        rows = lax.broadcasted_iota(jnp.int32, loss.shape, 0)
        cols = lax.broadcasted_iota(jnp.int32, loss.shape, 1)
        flat = (blk * tr + rows) * lanes + cols
        loss = jnp.where(flat < total, loss, 0.0)

        if has_graphs:
            colsum = jnp.sum(loss, axis=0, keepdims=True)              # (1, lanes)
            per_graph = _dot_bf16x2(colsum, sel_ref[...])              # (1, G)
            out_ref[...] += per_graph[None]
        else:
            out_ref[...] = loss

    return kernel


def _bce_flat(pred, target, num_classes, num_graphs, tile_rows=None):
    has_graphs = bool(num_graphs)
    if has_graphs:
        N, C, G = pred.shape
        assert G == int(num_graphs)
        group = C * G
    else:
        N, C = pred.shape
        G = 1
        group = C
    assert C == num_classes, "BCE expects pred's class dim == num_classes"
    # TODO(synk): labels >= 65536 would need a 3-term split in _dot_bf16x2.

    labels_only = (target.ndim == 1)
    if labels_only:
        labels = target.astype(jnp.int32)
    else:
        assert target.shape == (N, C)
        labels = jnp.argmax(target, axis=1).astype(jnp.int32)   # first max == torch.max idx

    lanes = _choose_lanes(group)
    S = lanes // group                       # samples per lane row
    total = N * group
    R = _ceil_div(total, lanes)
    padded = R * lanes

    pred_flat = pred.reshape(-1)             # free: native row-major order, no transpose
    if padded != total:
        # TODO(synk): misaligned N*C*G pays one pad copy; aligned shapes are zero-copy.
        pred_flat = jnp.pad(pred_flat, (0, padded - total))
    pred_rows = pred_flat.reshape(R, lanes)

    if R * S != N:
        labels = jnp.pad(labels, (0, R * S - N))
    lab_rows = labels.reshape(R, S)

    l_idx = np.arange(lanes)
    cls_np = ((l_idx // G) % C) if has_graphs else (l_idx % C)
    cls_row = jnp.asarray(cls_np[None, :], dtype=jnp.float32)                    # (1, lanes)
    e_lab = jnp.asarray(np.arange(S)[:, None] == (l_idx[None, :] // group),
                        dtype=jnp.bfloat16)                                      # (S, lanes)

    args = [pred_rows, lab_rows]
    tcols = lanes // G
    if not labels_only:
        tgt_flat = target.reshape(-1)
        if has_graphs:
            need = R * tcols
            if need != N * C:
                tgt_flat = jnp.pad(tgt_flat, (0, need - N * C))
            tgt_rows = tgt_flat.reshape(R, tcols)
        else:
            if padded != total:
                tgt_flat = jnp.pad(tgt_flat, (0, padded - total))
            tgt_rows = tgt_flat.reshape(R, lanes)
        args.append(tgt_rows)
    args += [cls_row, e_lab]
    if has_graphs and not labels_only:
        e_tgt = jnp.asarray(np.arange(tcols)[:, None] == (l_idx[None, :] // G),
                            dtype=jnp.bfloat16)                                  # (tcols, lanes)
        args.append(e_tgt)
    if has_graphs:
        sel = jnp.asarray(l_idx[:, None] % G == np.arange(G)[None, :],
                          dtype=jnp.bfloat16)                                    # (lanes, G)
        args.append(sel)

    # block rows: ~512K elements per block keeps the f32 working set v7x-safe
    if tile_rows is not None:
        TR = min(int(tile_rows), R)
    else:
        TR = min(R, max(8, (1 << 19) // lanes))
    if TR < R:
        TR = max(8, (TR // 8) * 8)
    nblk = _ceil_div(R, TR)
    half = _ceil_div(nblk, 2)

    if has_graphs:
        grid = (2, half)                                    # 2-way split: both v7x cores

        def rows_map(p, i):
            return (jnp.minimum(p * half + i, nblk - 1), 0)

        def const_map(p, i):
            return (0, 0)

        out_map = lambda p, i: (p, 0, 0)
        out_shape = jax.ShapeDtypeStruct((2, 1, G), jnp.float32)
        out_block = (1, 1, G)
        semantics = ("parallel", "arbitrary")
    else:
        grid = (nblk,)
        rows_map = lambda i: (i, 0)
        const_map = lambda i: (0, 0)
        out_map = lambda i: (i, 0)
        out_shape = jax.ShapeDtypeStruct((R, lanes), jnp.float32)
        out_block = (TR, lanes)
        semantics = ("parallel",)

    in_specs = [pl.BlockSpec((TR, lanes), rows_map),
                pl.BlockSpec((TR, S), rows_map)]
    if not labels_only:
        in_specs.append(pl.BlockSpec((TR, tcols if has_graphs else lanes), rows_map))
    in_specs += [pl.BlockSpec((1, lanes), const_map),
                 pl.BlockSpec((S, lanes), const_map)]
    if has_graphs and not labels_only:
        in_specs.append(pl.BlockSpec((tcols, lanes), const_map))
    if has_graphs:
        in_specs.append(pl.BlockSpec((lanes, G), const_map))

    in_bytes = sum(_padbytes(s.block_shape, jnp.dtype(a.dtype).itemsize)
                   for s, a in zip(in_specs, args))
    out_bytes = _padbytes(out_block, 4)
    vmem = _vmem_limit(in_bytes, out_bytes, 6 * TR * lanes * 4)

    kernel = _make_bce_flat_kernel(lanes=lanes, total=total, num_classes=num_classes,
                                   has_graphs=has_graphs, labels_only=labels_only,
                                   half=half)
    out = pl.pallas_call(
        kernel,
        out_shape=out_shape,
        grid_spec=pltpu.PrefetchScalarGridSpec(
            num_scalar_prefetch=0, grid=grid,
            in_specs=in_specs,
            out_specs=pl.BlockSpec(out_block, out_map)),
        compiler_params=pltpu.CompilerParams(
            dimension_semantics=semantics, vmem_limit_bytes=vmem),
    )(*args)

    if has_graphs:
        return jnp.sum(out, axis=(0, 1)) * (1.0 / float(N * C))   # .mean(dim=(0,1))
    res = out.reshape(-1)
    if padded != total:
        res = res[:total]
    return res.reshape(N, C)


# --------------------------------------------------------------------------- CrossEntropy
def _make_ce_plain_kernel(N):
    def kernel(pred_ref, lab_ref, out_ref):
        pred = pred_ref[...].astype(jnp.float32)               # (C, TN)
        lab = lab_ref[...]                                     # (1, TN) int32
        m = jnp.max(pred, axis=0, keepdims=True)
        lse = jnp.log(jnp.sum(jnp.exp(pred - m), axis=0, keepdims=True)) + m
        logp = pred - lse
        row = lax.broadcasted_iota(jnp.int32, pred.shape, 0)
        val = -jnp.sum(jnp.where(row == lab, logp, 0.0), axis=0, keepdims=True)
        lane = (lax.broadcasted_iota(jnp.int32, val.shape, 1)
                + pl.program_id(0) * pred.shape[1])
        out_ref[...] = jnp.where(lane < N, val, 0.0)
    return kernel


def _make_ce_graph_kernel(C, N, half):
    def kernel(pred_ref, lab_ref, out_ref):
        i = pl.program_id(1)

        @pl.when(i == 0)
        def _init():
            out_ref[...] = jnp.zeros_like(out_ref)

        pred = pred_ref[...].astype(jnp.float32)               # (G, C, TN)
        lab = lab_ref[...]                                     # (1, TN)
        m = jnp.max(pred, axis=1, keepdims=True)
        lse = jnp.log(jnp.sum(jnp.exp(pred - m), axis=1, keepdims=True)) + m
        logp = pred - lse
        row = lax.broadcasted_iota(jnp.int32, (C, pred.shape[2]), 0)
        sel = row == lab
        per = -jnp.sum(jnp.where(sel[None], logp, 0.0), axis=1)    # (G, TN)
        blk = pl.program_id(0) * half + i
        lane = lax.broadcasted_iota(jnp.int32, per.shape, 1) + blk * pred.shape[2]
        per = jnp.where(lane < N, per, 0.0)                        # tail / clamped blocks
        out_ref[...] += jnp.sum(per, axis=1)[None, None, :]
    return kernel


def _ce_plain(pred, labels, tile_n=None):
    N, C = pred.shape
    # TODO(synk): CE still pays one HBM transpose pass of pred; the class-dim
    # softmax needs C on a non-lane axis.
    predT = pred.T
    lab2d = labels[None, :]
    Cp = _ceil_div(C, 8) * 8
    TN = _pick_tile_n(N, Cp * 4 * 4, tile_n)
    tiles = _ceil_div(N, TN)
    in_bytes = (_padbytes((C, TN), jnp.dtype(pred.dtype).itemsize)
                + _padbytes((1, TN), 4))
    vmem = _vmem_limit(in_bytes, _padbytes((1, TN), 4), 3 * Cp * TN * 4)
    out = pl.pallas_call(
        _make_ce_plain_kernel(N),
        out_shape=jax.ShapeDtypeStruct((1, N), jnp.float32),
        grid_spec=pltpu.PrefetchScalarGridSpec(
            num_scalar_prefetch=0, grid=(tiles,),
            in_specs=[pl.BlockSpec((C, TN), lambda i: (0, i)),
                      pl.BlockSpec((1, TN), lambda i: (0, i))],
            out_specs=pl.BlockSpec((1, TN), lambda i: (0, i))),
        compiler_params=pltpu.CompilerParams(
            dimension_semantics=("parallel",), vmem_limit_bytes=vmem),
    )(predT, lab2d)
    return out[0]


def _ce_graphs(pred, labels, num_graphs, tile_n=None):
    N, C, G = pred.shape
    assert G == int(num_graphs)
    # TODO(synk): CE still pays one HBM transpose pass of pred (see _ce_plain).
    predT = jnp.transpose(pred, (2, 1, 0))                      # (G, C, N)
    lab2d = labels[None, :]
    Cp = _ceil_div(C, 8) * 8
    TN = _pick_tile_n(N, G * Cp * 4 * 4, tile_n)
    tiles = _ceil_div(N, TN)
    half = _ceil_div(tiles, 2)                                  # 2-way split (v7x cores)
    in_bytes = (_padbytes((G, C, TN), jnp.dtype(pred.dtype).itemsize)
                + _padbytes((1, TN), 4))
    vmem = _vmem_limit(in_bytes, _padbytes((1, 1, G), 4), 3 * G * Cp * TN * 4)
    out = pl.pallas_call(
        _make_ce_graph_kernel(C, N, half),
        out_shape=jax.ShapeDtypeStruct((2, 1, G), jnp.float32),
        grid_spec=pltpu.PrefetchScalarGridSpec(
            num_scalar_prefetch=0, grid=(2, half),
            in_specs=[pl.BlockSpec((G, C, TN),
                                   lambda p, i: (0, 0, jnp.minimum(p * half + i, tiles - 1))),
                      pl.BlockSpec((1, TN),
                                   lambda p, i: (0, jnp.minimum(p * half + i, tiles - 1)))],
            out_specs=pl.BlockSpec((1, 1, G), lambda p, i: (p, 0, 0))),
        compiler_params=pltpu.CompilerParams(
            dimension_semantics=("parallel", "arbitrary"), vmem_limit_bytes=vmem),
    )(predT, lab2d)
    return jnp.sum(out, axis=(0, 1)) * (1.0 / float(N))          # .mean(dim=0)


# --------------------------------------------------------------------------- public API
def loss_forward(input_pred, target, *, use_cross_entropy=False, num_classes=None,
                 num_graphs=None, tile_n=None, tile_rows=None):
    """JAX/Pallas equivalent of Loss(use_cross_entropy, num_classes, num_graphs).forward."""
    pred = jnp.asarray(input_pred)
    target = jnp.asarray(target)
    assert target.ndim <= 2
    if use_cross_entropy:
        if target.ndim == 2:
            labels = jnp.argmax(target, axis=1).astype(jnp.int32)   # torch.max(t, 1) idx
        else:
            labels = target.astype(jnp.int32)
        if num_graphs:
            return _ce_graphs(pred, labels, num_graphs, tile_n)
        return _ce_plain(pred, labels, tile_n)
    assert num_classes is not None and num_classes >= 2, \
        "BCE path needs num_classes >= 2 (scale divides by num_classes - 1)"
    return _bce_flat(pred, target, num_classes,
                     num_graphs if num_graphs else None, tile_rows)


def mixup_forward(pred, target_a, target_b, lam, **kw):
    # TODO(synk): a fused single-pass mixup kernel would halve pred HBM reads.
    return lam * loss_forward(pred, target_a, **kw) + \
        (1.0 - lam) * loss_forward(pred, target_b, **kw)


# --------------------------------------------------------------------------- references
def _ref_bce(pred, tgt2d, num_classes, has_graphs):
    pred = pred.astype(jnp.float32)
    tgt2d = tgt2d.astype(jnp.float32)
    idx = jnp.argmax(tgt2d, axis=1)                         # first-max == torch.max index
    scale = jnp.ones_like(tgt2d)
    scale = scale.at[jnp.arange(tgt2d.shape[0]), idx].set(float(num_classes - 1))
    scale = scale / float(num_classes - 1)
    log_p = jnp.maximum(jnp.log(pred), -100.0)
    log_q = jnp.maximum(jnp.log(1.0 - pred), -100.0)
    if has_graphs:
        t3 = tgt2d[:, :, None]
        loss = -(t3 * log_p + (1.0 - t3) * log_q) * scale[:, :, None]
        return jnp.mean(loss, axis=(0, 1))
    return -(tgt2d * log_p + (1.0 - tgt2d) * log_q) * scale


def _ref_ce(pred, labels, has_graphs):
    pred = pred.astype(jnp.float32)
    logp = jax.nn.log_softmax(pred, axis=1)
    if has_graphs:
        loss = -jnp.take_along_axis(logp, labels[:, None, None], axis=1)[:, 0, :]
        return jnp.mean(loss, axis=0)
    return -jnp.take_along_axis(logp, labels[:, None], axis=1)[:, 0]


# --------------------------------------------------------------------------- main
if __name__ == "__main__":
    key = jax.random.PRNGKey(0)
    N, C, G = 384, 4, 8
    k1, k2, k3, k4, k5, k6, k7 = jax.random.split(key, 7)

    labels = jax.random.randint(k2, (N,), 0, C)
    tgt_onehot = jax.nn.one_hot(labels, C, dtype=jnp.float32)
    tgt_soft = 0.8 * tgt_onehot + 0.1                       # soft 2-D BCE target

    # 1) BCE + num_graphs, bf16 pred, integer labels (single-log flat path).
    #    Small tile_rows only to exercise the multi-block grid + 2-way core split.
    pred_g = jax.nn.sigmoid(jax.random.normal(k1, (N, C, G), jnp.float32))
    pred_g_bf16 = pred_g.astype(jnp.bfloat16)
    out_bce_g = loss_forward(pred_g_bf16, labels, use_cross_entropy=False,
                             num_classes=C, num_graphs=G, tile_rows=8)
    ref_bce_g = _ref_bce(pred_g_bf16.astype(jnp.float32), tgt_onehot, C, True)

    # 2) BCE + num_graphs, float (soft) 2-D target, auto tile.
    out_bce_g2 = loss_forward(pred_g, tgt_soft, use_cross_entropy=False,
                              num_classes=C, num_graphs=G)
    ref_bce_g2 = _ref_bce(pred_g, tgt_soft, C, True)

    # 3) BCE no-graphs, float target, misaligned N (exercises the pad fallback).
    N2 = 300
    pred_b = jax.nn.sigmoid(jax.random.normal(k3, (N2, C), jnp.float32))
    out_bce = loss_forward(pred_b, tgt_soft[:N2], use_cross_entropy=False, num_classes=C)
    ref_bce = _ref_bce(pred_b, tgt_soft[:N2], C, False)

    # 4) BCE no-graphs, integer labels, multi-block grid.
    N3 = 2560
    labels3 = jax.random.randint(k6, (N3,), 0, C)
    pred_b3 = jax.nn.sigmoid(jax.random.normal(k7, (N3, C), jnp.float32))
    out_bce_lab = loss_forward(pred_b3, labels3, use_cross_entropy=False,
                               num_classes=C, tile_rows=8)
    ref_bce_lab = _ref_bce(pred_b3, jax.nn.one_hot(labels3, C, dtype=jnp.float32),
                           C, False)

    # 5) CE + num_graphs, 2-D target, partial tail tile + 2-way core split.
    Np = 300
    pred_ce_g = jax.random.normal(k4, (Np, C, G), jnp.float32)
    out_ce_g = loss_forward(pred_ce_g, tgt_onehot[:Np], use_cross_entropy=True,
                            num_graphs=G, tile_n=128)
    ref_ce_g = _ref_ce(pred_ce_g, labels[:Np], True)

    # 6) CE no-graphs, 1-D integer target.
    pred_ce = jax.random.normal(k5, (N, C), jnp.float32)
    out_ce = loss_forward(pred_ce, labels, use_cross_entropy=True, tile_n=128)
    ref_ce = _ref_ce(pred_ce, labels, False)

    jax.block_until_ready((out_bce_g, out_bce_g2, out_bce, out_bce_lab,
                           out_ce_g, out_ce))

    assert out_bce_g.shape == (G,) and out_bce_g2.shape == (G,)
    assert out_bce.shape == (N2, C) and out_bce_lab.shape == (N3, C)
    assert out_ce_g.shape == (G,) and out_ce.shape == (N,)
    assert jnp.allclose(out_bce_g, ref_bce_g, atol=1e-4, rtol=1e-4)
    assert jnp.allclose(out_bce_g2, ref_bce_g2, atol=1e-4, rtol=1e-4)
    assert jnp.allclose(out_bce, ref_bce, atol=1e-5, rtol=1e-5)
    assert jnp.allclose(out_bce_lab, ref_bce_lab, atol=1e-5, rtol=1e-5)
    assert jnp.allclose(out_ce_g, ref_ce_g, atol=1e-4, rtol=1e-4)
    assert jnp.allclose(out_ce, ref_ce, atol=1e-5, rtol=1e-5)

    print("KERNEL_OK")
</pallas_src>

<mosaic_0001>
module attributes {stable_mosaic.version = 11 : i64} {
  func.func @kernel(%arg0: i32, %arg1: i32, %arg2: memref<8x512xbf16, #tpu.memory_space<vmem>>, %arg3: memref<8x16xi32, #tpu.memory_space<vmem>>, %arg4: memref<1x512xf32, #tpu.memory_space<vmem>>, %arg5: memref<16x512xbf16, #tpu.memory_space<vmem>>, %arg6: memref<512x8xbf16, #tpu.memory_space<vmem>>, %arg7: memref<1x1x8xf32, #tpu.memory_space<vmem>>) attributes {dimension_semantics = [#tpu.dimension_semantics<parallel>, #tpu.dimension_semantics<arbitrary>], iteration_bounds = array<i64: 2, 2>, scalar_prefetch = 0 : i64, scratch_operands = 0 : i64, tpu.core_type = #tpu.core_type<tc>, window_params = [{transform_indices = @transform_0, window_bounds = array<i64: 8, 512>}, {transform_indices = @transform_1, window_bounds = array<i64: 8, 16>}, {pipeline_mode = #tpu.pipeline_mode<synchronous>, transform_indices = @transform_2, window_bounds = array<i64: 1, 512>}, {pipeline_mode = #tpu.pipeline_mode<synchronous>, transform_indices = @transform_3, window_bounds = array<i64: 16, 512>}, {pipeline_mode = #tpu.pipeline_mode<synchronous>, transform_indices = @transform_4, window_bounds = array<i64: 512, 8>}, {transform_indices = @transform_5, window_bounds = array<i64: 1, 1, 8>}]} {
    %c2_i32 = arith.constant 2 : i32
    %0 = arith.muli %arg0, %c2_i32 : i32
    %1 = arith.addi %0, %arg1 : i32
    %c0_i32 = arith.constant 0 : i32
    %2 = arith.cmpi eq, %arg1, %c0_i32 : i32
    %3 = arith.extui %2 : i1 to i32
    %c0_i32_0 = arith.constant 0 : i32
    %4 = arith.cmpi ne, %3, %c0_i32_0 : i32
    scf.if %4 {
      %cst_26 = arith.constant 0.000000e+00 : f32
      %58 = vector.broadcast %cst_26 : f32 to vector<1x1x8xf32>
      %c0_27 = arith.constant 0 : index
      %c0_28 = arith.constant 0 : index
      %c0_29 = arith.constant 0 : index
      %59 = vector.load %arg7[%c0_27, %c0_28, %c0_29] : memref<1x1x8xf32, #tpu.memory_space<vmem>>, vector<1x1x8xf32>
      tpu.vector_store %arg7[%c0_27, %c0_28, %c0_29], %58 {strides = array<i32>} : memref<1x1x8xf32, #tpu.memory_space<vmem>>, vector<1x1x8xf32>,
    } else {
    }
    %c0 = arith.constant 0 : index
    %c0_1 = arith.constant 0 : index
    %5 = vector.load %arg2[%c0, %c0_1] : memref<8x512xbf16, #tpu.memory_space<vmem>>, vector<8x512xbf16>
    %6 = arith.extf %5 : vector<8x512xbf16> to vector<8x512xf32>
    %c0_2 = arith.constant 0 : index
    %c0_3 = arith.constant 0 : index
    %7 = vector.load %arg3[%c0_2, %c0_3] : memref<8x16xi32, #tpu.memory_space<vmem>>, vector<8x16xi32>
    %8 = arith.sitofp %7 : vector<8x16xi32> to vector<8x16xf32>
    %c0_4 = arith.constant 0 : index
    %c0_5 = arith.constant 0 : index
    %9 = vector.load %arg5[%c0_4, %c0_5] : memref<16x512xbf16, #tpu.memory_space<vmem>>, vector<16x512xbf16>
    %10 = arith.truncf %8 : vector<8x16xf32> to vector<8x16xbf16>
    %11 = arith.extf %10 : vector<8x16xbf16> to vector<8x16xf32>
    %12 = arith.subf %8, %11 : vector<8x16xf32>
    %13 = arith.truncf %12 : vector<8x16xf32> to vector<8x16xbf16>
    %cst = arith.constant dense<0.000000e+00> : vector<8x512xf32>
    %14 = tpu.matmul %10, %9, %cst {dimension_numbers = #tpu.dot_dimension_numbers<[1], [0], [0], [1], [0, 0, 1, 1], [], []>} : vector<8x16xbf16>, vector<16x512xbf16>, vector<8x512xf32> -> vector<8x512xf32>
    %cst_6 = arith.constant dense<0.000000e+00> : vector<8x512xf32>
    %15 = tpu.matmul %13, %9, %cst_6 {dimension_numbers = #tpu.dot_dimension_numbers<[1], [0], [0], [1], [0, 0, 1, 1], [], []>} : vector<8x16xbf16>, vector<16x512xbf16>, vector<8x512xf32> -> vector<8x512xf32>
    %16 = arith.addf %14, %15 : vector<8x512xf32>
    %c0_7 = arith.constant 0 : index
    %c0_8 = arith.constant 0 : index
    %17 = vector.load %arg4[%c0_7, %c0_8] : memref<1x512xf32, #tpu.memory_space<vmem>>, vector<1x512xf32>
    %18 = vector.broadcast %17 : vector<1x512xf32> to vector<8x512xf32>
    %19 = arith.cmpf oeq, %18, %16 : vector<8x512xf32>
    %cst_9 = arith.constant 1.000000e+00 : f32
    %cst_10 = arith.constant 0.333333343 : f32
    %20 = vector.broadcast %cst_9 : f32 to vector<8x512xf32>
    %21 = vector.broadcast %cst_10 : f32 to vector<8x512xf32>
    %22 = arith.select %19, %20, %21 : vector<8x512xi1>, vector<8x512xf32>
    %cst_11 = arith.constant 1.000000e+00 : f32
    %23 = vector.broadcast %cst_11 : f32 to vector<8x512xf32>
    %24 = arith.subf %23, %6 : vector<8x512xf32>
    %25 = arith.select %19, %6, %24 : vector<8x512xi1>, vector<8x512xf32>
    %26 = math.log %25 : vector<8x512xf32>
    %cst_12 = arith.constant -1.000000e+02 : f32
    %27 = vector.broadcast %cst_12 : f32 to vector<8x512xf32>
    %28 = arith.maximumf %26, %27 : vector<8x512xf32>
    %cst_13 = arith.constant 0.000000e+00 : f32
    %29 = vector.broadcast %cst_13 : f32 to vector<8x512xf32>
    %30 = arith.subf %29, %28 : vector<8x512xf32>
    %31 = arith.mulf %30, %22 : vector<8x512xf32>
    %32 = tpu.iota {dimensions = array<i32: 0>} : vector<8x512xi32>
    %33 = tpu.iota {dimensions = array<i32: 1>} : vector<8x512xi32>
    %c8_i32 = arith.constant 8 : i32
    %34 = arith.muli %1, %c8_i32 : i32
    %35 = vector.broadcast %34 : i32 to vector<8x512xi32>
    %36 = arith.addi %35, %32 : vector<8x512xi32>
    %c512_i32 = arith.constant 512 : i32
    %37 = vector.broadcast %c512_i32 : i32 to vector<8x512xi32>
    %38 = arith.muli %36, %37 : vector<8x512xi32>
    %39 = arith.addi %38, %33 : vector<8x512xi32>
    %c12288_i32 = arith.constant 12288 : i32
    %40 = vector.broadcast %c12288_i32 : i32 to vector<8x512xi32>
    %41 = arith.cmpi slt, %39, %40 : vector<8x512xi32>
    %cst_14 = arith.constant 0.000000e+00 : f32
    %42 = vector.broadcast %cst_14 : f32 to vector<8x512xf32>
    %43 = arith.select %41, %31, %42 : vector<8x512xi1>, vector<8x512xf32>
    %cst_15 = arith.constant dense<0.000000e+00> : vector<512xf32>
    %44 = vector.multi_reduction <add>, %43, %cst_15 [0] : vector<8x512xf32> to vector<512xf32>
    %45 = vector.shape_cast %44 : vector<512xf32> to vector<1x512xf32>
    %c0_16 = arith.constant 0 : index
    %c0_17 = arith.constant 0 : index
    %46 = vector.load %arg6[%c0_16, %c0_17] : memref<512x8xbf16, #tpu.memory_space<vmem>>, vector<512x8xbf16>
    %47 = arith.truncf %45 : vector<1x512xf32> to vector<1x512xbf16>
    %48 = arith.extf %47 : vector<1x512xbf16> to vector<1x512xf32>
    %49 = arith.subf %45, %48 : vector<1x512xf32>
    %50 = arith.truncf %49 : vector<1x512xf32> to vector<1x512xbf16>
    %cst_18 = arith.constant dense<0.000000e+00> : vector<1x8xf32>
    %51 = tpu.matmul %47, %46, %cst_18 {dimension_numbers = #tpu.dot_dimension_numbers<[1], [0], [0], [1], [0, 0, 1, 1], [], []>} : vector<1x512xbf16>, vector<512x8xbf16>, vector<1x8xf32> -> vector<1x8xf32>
    %cst_19 = arith.constant dense<0.000000e+00> : vector<1x8xf32>
    %52 = tpu.matmul %50, %46, %cst_19 {dimension_numbers = #tpu.dot_dimension_numbers<[1], [0], [0], [1], [0, 0, 1, 1], [], []>} : vector<1x512xbf16>, vector<512x8xbf16>, vector<1x8xf32> -> vector<1x8xf32>
    %53 = arith.addf %51, %52 : vector<1x8xf32>
    %c0_20 = arith.constant 0 : index
    %c0_21 = arith.constant 0 : index
    %c0_22 = arith.constant 0 : index
    %54 = vector.load %arg7[%c0_20, %c0_21, %c0_22] : memref<1x1x8xf32, #tpu.memory_space<vmem>>, vector<1x1x8xf32>
    %55 = vector.shape_cast %53 : vector<1x8xf32> to vector<1x1x8xf32>
    %56 = arith.addf %54, %55 : vector<1x1x8xf32>
    %c0_23 = arith.constant 0 : index
    %c0_24 = arith.constant 0 : index
    %c0_25 = arith.constant 0 : index
    %57 = vector.load %arg7[%c0_23, %c0_24, %c0_25] : memref<1x1x8xf32, #tpu.memory_space<vmem>>, vector<1x1x8xf32>
    tpu.vector_store %arg7[%c0_23, %c0_24, %c0_25], %56 {strides = array<i32>} : memref<1x1x8xf32, #tpu.memory_space<vmem>>, vector<1x1x8xf32>,
    return
  }
  func.func @transform_0(%arg0: i32, %arg1: i32) -> (i32, i32) {
    %c2_i32 = arith.constant 2 : i32
    %0 = arith.muli %arg0, %c2_i32 : i32
    %1 = arith.addi %0, %arg1 : i32
    %c2_i32_0 = arith.constant 2 : i32
    %2 = arith.minsi %1, %c2_i32_0 : i32
    %c0_i32 = arith.constant 0 : i32
    %c0_i32_1 = arith.constant 0 : i32
    return %2, %c0_i32 : i32, i32
  }
  func.func @transform_1(%arg0: i32, %arg1: i32) -> (i32, i32) {
    %c2_i32 = arith.constant 2 : i32
    %0 = arith.muli %arg0, %c2_i32 : i32
    %1 = arith.addi %0, %arg1 : i32
    %c2_i32_0 = arith.constant 2 : i32
    %2 = arith.minsi %1, %c2_i32_0 : i32
    %c0_i32 = arith.constant 0 : i32
    %c0_i32_1 = arith.constant 0 : i32
    return %2, %c0_i32 : i32, i32
  }
  func.func @transform_2(%arg0: i32, %arg1: i32) -> (i32, i32) {
    %c0_i32 = arith.constant 0 : i32
    %c0_i32_0 = arith.constant 0 : i32
    %c0_i32_1 = arith.constant 0 : i32
    return %c0_i32, %c0_i32_0 : i32, i32
  }
  func.func @transform_3(%arg0: i32, %arg1: i32) -> (i32, i32) {
    %c0_i32 = arith.constant 0 : i32
    %c0_i32_0 = arith.constant 0 : i32
    %c0_i32_1 = arith.constant 0 : i32
    return %c0_i32, %c0_i32_0 : i32, i32
  }
  func.func @transform_4(%arg0: i32, %arg1: i32) -> (i32, i32) {
    %c0_i32 = arith.constant 0 : i32
    %c0_i32_0 = arith.constant 0 : i32
    %c0_i32_1 = arith.constant 0 : i32
    return %c0_i32, %c0_i32_0 : i32, i32
  }
  func.func @transform_5(%arg0: i32, %arg1: i32) -> (i32, i32, i32) {
    %c0_i32 = arith.constant 0 : i32
    %c0_i32_0 = arith.constant 0 : i32
    %c0_i32_1 = arith.constant 0 : i32
    return %arg0, %c0_i32, %c0_i32_0 : i32, i32, i32
  }
}

</mosaic_0001>

<bundles_post_ra>
// kernel: tpu_custom_call.1
= control target key start
LH: loop header
LB: loop body
LE: loop exit
PB: predicated region body
PF: predicated region fallthrough
CT: control target
= control target key end

     0   :  { %10 = vsyncpa [#allocation3], 0  ;;  %s1979_s0 = inlined_call_operand.vmem [shape: bf16[24,512], index: 0, kind: input, shape index: {}]   ;;  %s1980_s1 = inlined_call_operand.vmem [shape: s32[24,16], index: 1, kind: input, shape index: {}]   ;;  %s1981_s2 = inlined_call_operand.vmem [shape: f32[1,512], index: 2, kind: input, shape index: {}]   ;;  %s1982_s3 = inlined_call_operand.vmem [shape: bf16[16,512], index: 3, kind: input, shape index: {}]   ;;  %s1983_s4 = inlined_call_operand.vmem [shape: bf16[512,8], index: 4, kind: input, shape index: {}]   ;;  %s1984_s5 = inlined_call_operand.hbm [shape: f32[2,1,8], index: 5, kind: output, shape index: {}]  }
   0x1   :  { %12 = vsyncpa [#allocation3 + $0x1], 0  ;;  %s1568_s18 = smov 0   ;;  %s1570_s19 = smov 0  }
   0x2   :  { %s1572_s20 = smov 0   ;;  %s1574_s21 = smov 0  }
   0x3   :  { %s1576_s22 = smov 0   ;;  %s1578_s23 = smov 0  }
   0x4   :  { %s1580_s24 = smov 0   ;;  %s1582_s25 = smov 0  }
   0x5 LB: > { %s1155_s26 = sadd.s32 4294967295, %s1532_s25   ;;  %s1156_s27 = sadd.s32 4294967294, %s1532_s25   ;;  %s1532_s25 = sphi %s1582_s25, %s18_s25   ;;  %s1528_s24 = sphi %s1580_s24, %s1996_s24   ;;  %s1524_s23 = sphi %s1578_s23, %s1995_s23   ;;  %s1520_s22 = sphi %s1576_s22, %s1994_s22   ;;  %s1516_s21 = sphi %s1574_s21, %s1993_s21   ;;  %s1512_s20 = sphi %s1572_s20, %s1992_s20   ;;  %s1508_s19 = sphi %s1570_s19, %s1991_s19   ;;  %s1504_s18 = sphi %s1568_s18, %s1990_s18  }
   0x6   : > { %s27_s28 = sadd.s32 1, %s1524_s23  ;;  %s30_s29 = sadd.s32 1, %s1528_s24 }
   0x7   : > { %p28_p0 = scmp.ge.s32.totalorder %s27_s28, 2  ;;  %p178_p1 = scmp.ne.s32.totalorder %s1512_s20, %s1508_s19 }
   0x8   : > { %p179_p2 = scmp.eq.s32.totalorder %s1155_s26, 3  ;;  %p184_p4 = scmp.ne.s32.totalorder %s1508_s19, %s1504_s18 }
   0x9   : > { %s1998_s28 = smov (%p28_p0, %s27_s28), 0  ;;  %s2000_s29 = smov (!%p28_p0, %s30_s29), %s1528_s24 }
   0xa   : > { %p1617_p3 = por %p179_p2, %p178_p1  ;;  %p32_p5 = scmp.ge.s32.totalorder %s2000_s29, 2 }
   0xb   : > { %p185_p6 = scmp.eq.s32.totalorder %s1156_s27, 3  ;;  %p1163_p7 = scmp.ge.s32.totalorder %s1532_s25, 1 }
   0xc   : > { %p243_p8 = scmp.lt.s32.totalorder %s1532_s25, 5  ;;  %s2002_s29 = smov (%p32_p5, %s2000_s29), 0 }
   0xd   : > { %1987 = sst [smem:[#allocation5_spill]] %s2002_s29  ;;  %p1627_p9 = por %p185_p6, %p184_p4 }
   0xe   : > { %p244_p10 = pnand %p1163_p7, %p243_p8  ;;  %s165_s7 = ssub.s32 %s1528_s24, %s2002_s29 }
   0xf   : > { %s168_s8 = sadd.s32 1, %s1512_s20  ;;  %p166_p11 = scmp.eq.s32.totalorder %s165_s7, 0 }
  0x10   : > { %247 = sbr.rel (%p244_p10) target bundleno = 579 (0x243), region = 40  ;;  %s280_s10 = sand.u32 (!%p244_p10), 1, %s1508_s19  }
  0x11   : > { %s1635_s9 = scalar_select %p166_p11, %s1512_s20, %s168_s8  }
  0x12   : > { %s1164_s11 = sshll.u32 (!%p244_p10), %s1520_s22, 1  ;;  %s1654_s29 = scalar_lea.vmem (!%p244_p10), [#allocation2], %s280_s10 }
  0x13   : > { %s1640_s12 = sadd.s32 (!%p244_p10), %s1516_s21, %s1164_s11  ;;  %p1176_p13 = scmp.ne.s32.totalorder (!%p244_p10), %s1516_s21, 0 }
  0x14   : > { %p284_p12 = scmp.lt.s32.totalorder (!%p244_p10), %s1640_s12, 2 }
  0x17   : > { %s285_s13 = scalar_select %p284_p12, %s1640_s12, 2 }
  0x18   : > { %313 = sbr.rel (%p1176_p13) target bundleno = 31 (0x1f), region = 44  ;;  %vm314_vm0 = vcmask (!%p1176_p13), 57344   ;;  %v1534_v0 = vmov (!%p1176_p13), 0.0  }
  0x19   : > { %s2004_s13 = smov (!%p284_p12, %s285_s13), 2  ;;  %315 = vst.msk [vmem:[%s1654_s29] sm:$0x1] (!%p1176_p13), %vm314_vm0, %v1534_v0 }
  0x1a   : > { %s1221_s14 = sshll.u32 %s2004_s13, 4  ;;  %s1174_s15 = sshll.u32 %s2004_s13, 3 }
  0x1b   : > { %s1647_s26 = scalar_lea.vmem %s1979_s0, %s1221_s14  ;;  %s302_s8 = scalar_lea.vmem %s1980_s1, %s1174_s15 }
  0x1f PF: > { %v1392_v1 = vld [vmem:[%s1982_s3 + $0x4] ss:$16 sps:$4 sm:$0xff]   ;;  %v1394_v2 = vld [vmem:[%s1982_s3] ss:$16 sps:$4 sm:$0xff]   ;;  %v1535_v3 = vmov 0   ;;  %vm352_vm1 = vcmask 130048   ;;  %v525_v44 = vlaneseq }
  0x20   : > { %388 = vmatprep.mubr.bf16.mxu0 %v1535_v3  ;;  %429 = vmatprep.mubr.bf16.mxu1 %v1535_v3  ;;  %v1395_v4 = vld [vmem:[%s1982_s3 + $0xc] ss:$16 sps:$4 sm:$0xff]   ;;  %v1397_v5 = vld [vmem:[%s1982_s3 + $0x8] ss:$16 sps:$4 sm:$0xff]   ;;  %v322_v6 = vld [vmem:[%s302_s8] sm:$0xff]  ;;  %s1077_s15 = sshll.u32 %s1654_s29, 4  ;;  %s1925_s15 = int_to_ptr.vmem [resolvable:$true] %s1077_s15 }
  0x21   : > { %356 = vmatprep.subr.bf16.mxu0 %v1392_v1  ;;  %v323_v7 = vcvt.s32.f32 %v322_v6  ;;  %397 = vmatprep.subr.bf16.mxu1 %v1395_v4  ;;  %v1677_v12 = vld [vmem:[%s1983_s4 + $0x40] sm:$0xff]   ;;  %v1701_v16 = vld [vmem:[%s1983_s4 + $0x48] sm:$0xff]   ;;  %v1725_v20 = vld [vmem:[%s1983_s4 + $0x50] sm:$0xff]   ;;  %v526_v45 = vshrl.u32 %v525_v44, 7  ;;  %vm1062_vm10 = vcmask 57344   ;;  %s1065_s7 = scalar_lea.sflag [#allocation3], %s280_s10 }
  0x22   : > { %357 = vmatpush1.bf16.msra.mxu0 %v1394_v2  ;;  %398 = vmatpush1.bf16.msra.mxu1 %v1397_v5  ;;  %v1682_v13 = vld [vmem:[%s1983_s4 + $0xc0] sm:$0xff]   ;;  %v1706_v17 = vld [vmem:[%s1983_s4 + $0xc8] sm:$0xff]   ;;  %v1730_v21 = vld [vmem:[%s1983_s4 + $0xd0] sm:$0xff]   ;;  %s1438_s8 = scalar_lea.vmem %s1925_s15, 16 }
  0x23   : > { %441 = vmatprep.subr.bf16.mxu0 %v1392_v1  ;;  %v328_v8 = vpack.c.bf16 %v323_v7, %v323_v7  ;;  %482 = vmatprep.subr.bf16.mxu1 %v1395_v4  ;;  %v1687_v14 = vld [vmem:[%s1983_s4] sm:$0xff]   ;;  %v1711_v18 = vld [vmem:[%s1983_s4 + $0x8] sm:$0xff]   ;;  %v1735_v22 = vld [vmem:[%s1983_s4 + $0x10] sm:$0xff]   ;;  %v527_v48 = vsub.s32 0, %v526_v45  ;;  %v535_v49 = vsub.s32 2, %v526_v45  ;;  %v531_v53 = vsub.s32 1, %v526_v45  ;;  %p1439_p0 = scmp.ne.s32.totalorder %s1925_s15, %s1438_s8 }
  0x24   : > { %v1692_v15 = vld [vmem:[%s1983_s4 + $0x80] sm:$0xff]   ;;  %v1716_v19 = vld [vmem:[%s1983_s4 + $0x88] sm:$0xff]   ;;  %v1740_v23 = vld [vmem:[%s1983_s4 + $0x90] sm:$0xff]   ;;  %v539_v54 = vsub.s32 3, %v526_v45 }
  0x25   : > { %v329_v9 = vunpack.c.l.bf16 %v328_v8  ;;  %v1749_v24 = vld [vmem:[%s1983_s4 + $0x58] sm:$0xff]   ;;  %v1773_v28 = vld [vmem:[%s1983_s4 + $0x60] sm:$0xff]   ;;  %v1797_v32 = vld [vmem:[%s1983_s4 + $0x68] sm:$0xff]   ;;  %p1440_p1 = pnand %p1439_p0, %p1617_p3 }
  0x26   : > { %v1754_v25 = vld [vmem:[%s1983_s4 + $0xd8] sm:$0xff]   ;;  %v1778_v29 = vld [vmem:[%s1983_s4 + $0xe0] sm:$0xff]   ;;  %v1802_v33 = vld [vmem:[%s1983_s4 + $0xe8] sm:$0xff]  }
  0x27   : > { %v330_v10 = vsub.f32 %v323_v7, %v329_v9  ;;  %v1759_v26 = vld [vmem:[%s1983_s4 + $0x18] sm:$0xff]   ;;  %v1783_v30 = vld [vmem:[%s1983_s4 + $0x20] sm:$0xff]   ;;  %v1807_v34 = vld [vmem:[%s1983_s4 + $0x28] sm:$0xff]   ;;  %p1441_p2 = pneg %p1440_p1 }
  0x28   : > { %v1764_v27 = vld [vmem:[%s1983_s4 + $0x98] sm:$0xff]   ;;  %v1788_v31 = vld [vmem:[%s1983_s4 + $0xa0] sm:$0xff]   ;;  %v1812_v35 = vld [vmem:[%s1983_s4 + $0xa8] sm:$0xff]  }
  0x29   : > { %v331_v11 = vpack.c.bf16 %v330_v10, %v330_v10  ;;  %v1821_v36 = vld [vmem:[%s1983_s4 + $0x70] sm:$0xff]   ;;  %v1841_v40 = vld [vmem:[%s1983_s4 + $0x78] sm:$0xff]   ;;  %v316_v46 = vld [vmem:[%s1647_s26] sm:$0xff] }
  0x2a   : > { %v1826_v37 = vld [vmem:[%s1983_s4 + $0xf0] sm:$0xff]   ;;  %v1846_v41 = vld [vmem:[%s1983_s4 + $0xf8] sm:$0xff]   ;;  %v317_v47 = vld [vmem:[%s1647_s26 + $0x8] sm:$0xff]  ;;  %v318_v50 = vunpack.c.l.bf16 %v316_v46  ;;  %v319_v55 = vunpack.c.h.bf16 %v316_v46  ;;  %s1185_s26 = sshll.u32 %s1640_s12, 3  ;;  %s1218_s12 = sshll.u32 %s1520_s22, 4 }
  0x2b   : > { %1181 = vmatmul.mubr.msk.bf16.vlgmr.msra.gmra.mrb[0].mxu0 %vm352_vm1, %v331_v11  ;;  %1182 = vmatmul.mubr.msk.bf16.vlgmr.msra.gmra.mrb[0].mxu1 %vm352_vm1, %v331_v11  ;;  %v1831_v38 = vld [vmem:[%s1983_s4 + $0x30] sm:$0xff]   ;;  %v1855_v42 = vld [vmem:[%s1983_s4 + $0x38] sm:$0xff]   ;;  %v523_v51 = vld [vmem:[%s1981_s2] sm:$0xf]  ;;  %v320_v52 = vunpack.c.l.bf16 %v317_v47  ;;  %v321_v58 = vunpack.c.h.bf16 %v317_v47  ;;  %v589_v11 = vstv %s1185_s26  ;;  %v584_v47 = vand.u32 127, %v525_v44  ;;  %s1923_s27 = scalar_lea.hbm %s1984_s5, %s1218_s12  ;;  %s1537_s22 = smov [#allocation2]  }
  0x2c   : > { %442 = vmatpush1.bf16.msra.mxu0 %v1394_v2  ;;  %483 = vmatpush1.bf16.msra.mxu1 %v1397_v5  ;;  %v1836_v39 = vld [vmem:[%s1983_s4 + $0xb0] sm:$0xff]   ;;  %v1860_v43 = vld [vmem:[%s1983_s4 + $0xb8] sm:$0xff]   ;;  %v528_v56 = vrot.slane %v523_v51, %v527_v48  ;;  %v536_v57 = vrot.slane %v523_v51, %v535_v49  ;;  %v553_v59 = vsub.f32 1.0, %v318_v50  ;;  %v532_v61 = vrot.slane %v523_v51, %v531_v53  ;;  %s1442_s11 = sshll.u32 %s1537_s22, 4  ;;  %s1443_s11 = int_to_ptr.vmem [resolvable:$false] %s1442_s11 }
  0x2d   : > { %473 = vmatprep.mubr.bf16.mxu0 %v1535_v3  ;;  %514 = vmatprep.mubr.bf16.mxu1 %v1535_v3  ;;  %v555_v60 = vsub.f32 1.0, %v320_v52  ;;  %v1873_v62 = vrot.slane %v523_v51, %v539_v54  ;;  %v554_v1 = vsub.f32 1.0, %v319_v55  ;;  %v556_v4 = vsub.f32 1.0, %v321_v58  ;;  %s1444_s13 = scalar_lea.vmem %s1443_s11, 32  ;;  %p1445_p4 = scmp.lt.s32.totalorder %s1925_s15, %s1443_s11 }
  0x2e   : > { %1222 = vmatprep.subr.bf16.mxu0 %v1677_v12  ;;  %1244 = vmatprep.subr.bf16.mxu1 %v1682_v13  ;;  %v590_v46 = vadd.s32 %v589_v11, %v526_v45  ;;  %v586_v49 = vadd.s32 256, %v584_v47  ;;  %v585_v51 = vadd.s32 128, %v584_v47  ;;  %v587_v54 = vadd.s32 384, %v584_v47  ;;  %p1446_p5 = scmp.lt.s32.totalorder %s1444_s13, %s1438_s8 }
  0x30   : > { %v591_v48 = vmul.u32 512, %v590_v46  ;;  %p1447_p6 = por %p1446_p5, %p1445_p4 }
  0x32   : > { %v595_v44 = vadd.s32 %v591_v48, %v587_v54  ;;  %p1448_p7 = pnand %p1447_p6, %p1441_p2 }
  0x34   : > { %vm599_vm9 = vcmp.lt.s32.totalorder %v595_v44, 12288 }
  0x37   : > { %1183 = vmatmul.mubr.msk.bf16.vlgmr.msra.gmra.mrb[0].mxu0 %vm352_vm1, %v328_v8  ;;  %1184 = vmatmul.mubr.msk.bf16.vlgmr.msra.gmra.mrb[0].mxu1 %vm352_vm1, %v328_v8 }
  0x38   : > { %1223 = vmatpush3.bf16.msra.mxu0 %v1687_v14  ;;  %1245 = vmatpush3.bf16.msra.mxu1 %v1692_v15 }
  0x39   : > { %1224 = vmatprep.subr.bf16.mxu0 %v1701_v16  ;;  %1246 = vmatprep.subr.bf16.mxu1 %v1706_v17 }
  0x3c   : > { %1225 = vmatpush3.bf16.msra.mxu0 %v1711_v18  ;;  %1247 = vmatpush3.bf16.msra.mxu1 %v1716_v19 }
  0x3d   : > { %1226 = vmatprep.subr.bf16.mxu0 %v1725_v20  ;;  %1248 = vmatprep.subr.bf16.mxu1 %v1730_v21 }
  0x40   : > { %1227 = vmatpush3.bf16.msra.mxu0 %v1735_v22  ;;  %1249 = vmatpush3.bf16.msra.mxu1 %v1740_v23 }
  0x41   : > { %1228 = vmatprep.subr.bf16.mxu0 %v1749_v24  ;;  %1250 = vmatprep.subr.bf16.mxu1 %v1754_v25 }
  0x44   : > { %1229 = vmatpush3.bf16.msra.mxu0 %v1759_v26  ;;  %1251 = vmatpush3.bf16.msra.mxu1 %v1764_v27 }
  0x45   : > { %1230 = vmatprep.subr.bf16.mxu0 %v1773_v28  ;;  %1252 = vmatprep.subr.bf16.mxu1 %v1778_v29 }
  0x48   : > { %1231 = vmatpush3.bf16.msra.mxu0 %v1783_v30  ;;  %1253 = vmatpush3.bf16.msra.mxu1 %v1788_v31 }
  0x49   : > { %1232 = vmatprep.subr.bf16.mxu0 %v1797_v32  ;;  %1254 = vmatprep.subr.bf16.mxu1 %v1802_v33 }
  0x4c   : > { %1233 = vmatpush3.bf16.msra.mxu0 %v1807_v34  ;;  %1255 = vmatpush3.bf16.msra.mxu1 %v1812_v35 }
  0x4d   : > { %1234 = vmatprep.subr.bf16.mxu0 %v1821_v36  ;;  %1256 = vmatprep.subr.bf16.mxu1 %v1826_v37 }
  0x50   : > { %1235 = vmatpush3.bf16.msra.mxu0 %v1831_v38  ;;  %1257 = vmatpush3.bf16.msra.mxu1 %v1836_v39 }
  0x51   : > { %1236 = vmatprep.subr.bf16.mxu0 %v1841_v40  ;;  %1258 = vmatprep.subr.bf16.mxu1 %v1846_v41 }
  0x54   : > { %1237 = vmatpush3.bf16.msra.mxu0 %v1855_v42  ;;  %1259 = vmatpush3.bf16.msra.mxu1 %v1860_v43 }
  0x55   : > { %1266 = vmatprep.subr.bf16.mxu0 %v1677_v12  ;;  %1288 = vmatprep.subr.bf16.mxu1 %v1682_v13 }
 0x10a   : > { %v475_v63 = vpop.f32.mrb[0].mxu0  ;;  %v516_v0 = vpop.f32.mrb[0].mxu1 }
 0x10b   : > { %vm545_vm2 = vcmp.eq.f32.partialorder %v528_v56, %v475_v63  ;;  %vm547_vm3 = vcmp.eq.f32.partialorder %v536_v57, %v516_v0  ;;  %v477_v2 = vpop.f32.mrb[1].mxu0  ;;  %v518_v3 = vpop.f32.mrb[1].mxu1 }
 0x10c   : > { %v557_v5 = vsel %vm545_vm2, %v318_v50, %v553_v59  ;;  %v559_v6 = vsel %vm547_vm3, %v320_v52, %v555_v60  ;;  %v479_v7 = vpop.f32.mrb[2].mxu0  ;;  %v520_v8 = vpop.f32.mrb[2].mxu1  ;;  %vm546_vm4 = vcmp.eq.f32.partialorder %v532_v61, %v477_v2  ;;  %vm548_vm5 = vcmp.eq.f32.partialorder %v1873_v62, %v518_v3 }
 0x10d   : > { %1430 = vlog2.f32 %v557_v5  ;;  %v480_v9 = vpop.f32.mrb[3].mxu0  ;;  %v521_v10 = vpop.f32.mrb[3].mxu1  ;;  %v558_v12 = vsel %vm546_vm4, %v319_v55, %v554_v1  ;;  %v560_v13 = vsel %vm548_vm5, %v321_v58, %v556_v4  ;;  %v592_v60 = vadd.s32 %v591_v48, %v584_v47 }
 0x10e   : > { %1432 = vlog2.f32 %v559_v6  ;;  %v594_v55 = vadd.s32 %v591_v48, %v586_v49  ;;  %v593_v9 = vadd.s32 %v591_v48, %v585_v51  ;;  %v1536_v10 = vmov 0.33333334  }
 0x10f   : > { %1434 = vlog2.f32 %v558_v12  ;;  %v549_v11 = vsel %vm545_vm2, 1.0, %v1536_v10  ;;  %vm596_vm6 = vcmp.lt.s32.totalorder %v592_v60, 12288  ;;  %v551_v47 = vsel %vm547_vm3, 1.0, %v1536_v10 }
 0x110   : > { %1436 = vlog2.f32 %v560_v13  ;;  %vm598_vm7 = vcmp.lt.s32.totalorder %v594_v55, 12288  ;;  %v550_v49 = vsel %vm546_vm4, 1.0, %v1536_v10  ;;  %vm597_vm8 = vcmp.lt.s32.totalorder %v593_v9, 12288 }
 0x111   : > { %v552_v48 = vsel %vm548_vm5, 1.0, %v1536_v10 }
 0x117   : > { %v1431_v50 = vpop.eup %1430 }
 0x118   : > { %v1433_v52 = vpop.eup %1432  ;;  %v562_v53 = vmul.f32 0.6931472, %v1431_v50 }
 0x119   : > { %v1435_v59 = vpop.eup %1434  ;;  %v566_v5 = vmul.f32 0.6931472, %v1433_v52 }
 0x11a   : > { %v1437_v6 = vpop.eup %1436  ;;  %v569_v7 = vmax.f32 %v562_v53, -100.0  ;;  %v564_v1 = vmul.f32 0.6931472, %v1435_v59 }
 0x11b   : > { %v571_v8 = vmax.f32 %v566_v5, -100.0  ;;  %v568_v58 = vmul.f32 0.6931472, %v1437_v6 }
 0x11c   : > { %v573_v4 = vsub.f32 0.0, %v569_v7  ;;  %v570_v45 = vmax.f32 %v564_v1, -100.0 }
 0x11d   : > { %v575_v12 = vsub.f32 0.0, %v571_v8  ;;  %v572_v13 = vmax.f32 %v568_v58, -100.0 }
 0x11e   : > { %v577_v46 = vmul.f32 %v573_v4, %v549_v11  ;;  %v574_v50 = vsub.f32 0.0, %v570_v45 }
 0x11f   : > { %v579_v52 = vmul.f32 %v575_v12, %v551_v47  ;;  %v576_v51 = vsub.f32 0.0, %v572_v13 }
 0x120   : > { %v600_v53 = vsel %vm596_vm6, %v577_v46, 0.0  ;;  %v578_v59 = vmul.f32 %v574_v50, %v550_v49 }
 0x121   : > { %v604_v56 = vrot.slane %v600_v53, 4  ;;  %v602_v63 = vsel %vm598_vm7, %v579_v52, 0.0  ;;  %v580_v54 = vmul.f32 %v576_v51, %v552_v48 }
 0x122   : > { %v616_v60 = vrot.slane %v602_v63, 4  ;;  %v601_v5 = vsel %vm597_vm8, %v578_v59, 0.0 }
 0x123   : > { %v605_v57 = vadd.f32 %v604_v56, %v600_v53  ;;  %v610_v0 = vrot.slane %v601_v5, 4  ;;  %v603_v6 = vsel %vm599_vm9, %v580_v54, 0.0 }
 0x124   : > { %v617_v7 = vadd.f32 %v616_v60, %v602_v63  ;;  %v622_v55 = vrot.slane %v603_v6, 4 }
 0x125   : > { %v606_v61 = vrot.slane %v605_v57, 2  ;;  %v611_v2 = vadd.f32 %v610_v0, %v601_v5 }
 0x126   : > { %v618_v1 = vrot.slane %v617_v7, 2  ;;  %v623_v8 = vadd.f32 %v622_v55, %v603_v6 }
 0x127   : > { %v607_v9 = vadd.f32 %v606_v61, %v605_v57  ;;  %v612_v58 = vrot.slane %v611_v2, 2 }
 0x128   : > { %v619_v4 = vadd.f32 %v618_v1, %v617_v7  ;;  %v624_v62 = vrot.slane %v623_v8, 2 }
 0x129   : > { %v608_v3 = vrot.slane %v607_v9, 1  ;;  %v613_v45 = vadd.f32 %v612_v58, %v611_v2 }
 0x12a   : > { %v620_v44 = vrot.slane %v619_v4, 1  ;;  %v625_v10 = vadd.f32 %v624_v62, %v623_v8 }
 0x12b   : > { %v609_v11 = vadd.f32 %v608_v3, %v607_v9  ;;  %v614_v12 = vrot.slane %v613_v45, 1 }
 0x12c   : > { %v621_v13 = vadd.f32 %v620_v44, %v619_v4  ;;  %v626_v46 = vrot.slane %v625_v10, 1 }
 0x12d   : > { %v692_v47 = vpack.c.bf16 %v609_v11, %v609_v11  ;;  %v615_v50 = vadd.f32 %v614_v12, %v613_v45 }
 0x12e   : > { %v694_v52 = vpack.c.bf16 %v621_v13, %v621_v13  ;;  %v627_v49 = vadd.f32 %v626_v46, %v625_v10 }
 0x12f   : > { %v693_v51 = vpack.c.bf16 %v615_v50, %v615_v50  ;;  %v696_v53 = vunpack.c.l.bf16 %v692_v47 }
 0x130   : > { %v695_v59 = vpack.c.bf16 %v627_v49, %v627_v49  ;;  %v698_v48 = vunpack.c.l.bf16 %v694_v52 }
 0x131   : > { %v697_v56 = vunpack.c.l.bf16 %v693_v51  ;;  %v700_v54 = vsub.f32 %v609_v11, %v696_v53 }
 0x132   : > { %v699_v63 = vunpack.c.l.bf16 %v695_v59  ;;  %v702_v5 = vsub.f32 %v621_v13, %v698_v48 }
 0x133   : > { %v701_v60 = vsub.f32 %v615_v50, %v697_v56  ;;  %v704_v7 = vpack.c.bf16 %v700_v54, %v700_v54 }
 0x134   : > { %v703_v57 = vsub.f32 %v627_v49, %v699_v63  ;;  %v706_v55 = vpack.c.bf16 %v702_v5, %v702_v5 }
 0x135   : > { %v705_v0 = vpack.c.bf16 %v701_v60, %v701_v60 }
 0x136   : > { %v707_v6 = vpack.c.bf16 %v703_v57, %v703_v57 }
 0x137   : > { %932 = vmatprep.mubr.bf16.mxu0 %v705_v0 }
 0x138   : > { %972 = vmatprep.mubr.bf16.mxu1 %v707_v6  ;;  %933 = vmatmul.mubr.bf16.vlgmr.msra.gmra.mrb[4].mxu0 %v704_v7 }
 0x139   : > { %973 = vmatmul.mubr.bf16.vlgmr.msra.gmra.mrb[4].mxu1 %v706_v55  ;;  %1267 = vmatpush3.bf16.msra.mxu0 %v1687_v14 }
 0x13a   : > { %1289 = vmatpush3.bf16.msra.mxu1 %v1692_v15  ;;  %1012 = vmatprep.mubr.bf16.mxu0 %v693_v51 }
 0x13b   : > { %1052 = vmatprep.mubr.bf16.mxu1 %v695_v59  ;;  %1268 = vmatprep.subr.bf16.mxu0 %v1701_v16 }
 0x13c   : > { %1290 = vmatprep.subr.bf16.mxu1 %v1706_v17 }
 0x13d   : > { %1269 = vmatpush3.bf16.msra.mxu0 %v1711_v18 }
 0x13e   : > { %1291 = vmatpush3.bf16.msra.mxu1 %v1716_v19  ;;  %1270 = vmatprep.subr.bf16.mxu0 %v1725_v20 }
 0x13f   : > { %1292 = vmatprep.subr.bf16.mxu1 %v1730_v21 }
 0x141   : > { %1271 = vmatpush3.bf16.msra.mxu0 %v1735_v22 }
 0x142   : > { %1293 = vmatpush3.bf16.msra.mxu1 %v1740_v23  ;;  %1272 = vmatprep.subr.bf16.mxu0 %v1749_v24 }
 0x143   : > { %1294 = vmatprep.subr.bf16.mxu1 %v1754_v25 }
 0x145   : > { %1273 = vmatpush3.bf16.msra.mxu0 %v1759_v26 }
 0x146   : > { %1295 = vmatpush3.bf16.msra.mxu1 %v1764_v27  ;;  %1274 = vmatprep.subr.bf16.mxu0 %v1773_v28 }
 0x147   : > { %1296 = vmatprep.subr.bf16.mxu1 %v1778_v29 }
 0x149   : > { %1275 = vmatpush3.bf16.msra.mxu0 %v1783_v30 }
 0x14a   : > { %1297 = vmatpush3.bf16.msra.mxu1 %v1788_v31  ;;  %1276 = vmatprep.subr.bf16.mxu0 %v1797_v32 }
 0x14b   : > { %1298 = vmatprep.subr.bf16.mxu1 %v1802_v33 }
 0x14d   : > { %1277 = vmatpush3.bf16.msra.mxu0 %v1807_v34 }
 0x14e   : > { %1299 = vmatpush3.bf16.msra.mxu1 %v1812_v35  ;;  %1278 = vmatprep.subr.bf16.mxu0 %v1821_v36  ;;  %v1060_v36 = vld [vmem:[%s1654_s29] sm:$0x1] }
 0x14f   : > { %1300 = vmatprep.subr.bf16.mxu1 %v1826_v37 }
 0x151   : > { %1279 = vmatpush3.bf16.msra.mxu0 %v1831_v38 }
 0x152   : > { %1301 = vmatpush3.bf16.msra.mxu1 %v1836_v39  ;;  %1280 = vmatprep.subr.bf16.mxu0 %v1841_v40 }
 0x153   : > { %1302 = vmatprep.subr.bf16.mxu1 %v1846_v41 }
 0x155   : > { %1281 = vmatpush3.bf16.msra.mxu0 %v1855_v42 }
 0x156   : > { %1303 = vmatpush3.bf16.msra.mxu1 %v1860_v43 }
 0x158   : > { %1013 = vmatmul.mubr.bf16.vlgmr.msra.gmra.mrb[8].mxu0 %v692_v47 }
 0x159   : > { %1053 = vmatmul.mubr.bf16.vlgmr.msra.gmra.mrb[8].mxu1 %v694_v52 }
 0x20b   : > { %v1238_v14 = vpop.f32.mrb[4].mxu0 }
 0x20c   : > { %v1260_v15 = vpop.f32.mrb[4].mxu1  ;;  %v1239_v16 = vpop.f32.mrb[5].mxu0 }
 0x20d   : > { %v1240_v17 = vadd.f32 %v1239_v16, %v1238_v14  ;;  %v1261_v18 = vpop.f32.mrb[5].mxu1  ;;  %v1241_v19 = vpop.f32.mrb[6].mxu0 }
 0x20e   : > { %v1262_v20 = vadd.f32 %v1261_v18, %v1260_v15  ;;  %v1263_v21 = vpop.f32.mrb[6].mxu1  ;;  %v1242_v22 = vpop.f32.mrb[7].mxu0 }
 0x20f   : > { %v1264_v23 = vpop.f32.mrb[7].mxu1 }
 0x210   : > { %v975_v24 = vadd.f32 %v1262_v20, %v1240_v17 }
 0x22b   : > { %v1282_v25 = vpop.f32.mrb[8].mxu0 }
 0x22c   : > { %v1304_v26 = vpop.f32.mrb[8].mxu1  ;;  %v1283_v27 = vpop.f32.mrb[9].mxu0 }
 0x22d   : > { %v1284_v28 = vadd.f32 %v1283_v27, %v1282_v25  ;;  %v1305_v29 = vpop.f32.mrb[9].mxu1  ;;  %v1285_v30 = vpop.f32.mrb[10].mxu0 }
 0x22e   : > { %v1306_v31 = vadd.f32 %v1305_v29, %v1304_v26  ;;  %v1307_v32 = vpop.f32.mrb[10].mxu1  ;;  %v1286_v33 = vpop.f32.mrb[11].mxu0 }
 0x22f   : > { %v1015_v34 = vadd.f32 %v1284_v28, %v975_v24  ;;  %v1308_v35 = vpop.f32.mrb[11].mxu1 }
 0x231   : > { %v1055_v37 = vadd.f32 %v1306_v31, %v1015_v34 }
 0x233   : > { %v1061_v38 = vadd.f32 %v1060_v36, %v1055_v37 }
 0x235   : > { %1063 = vst.msk [vmem:[%s1654_s29] sm:$0x1] %vm1062_vm10, %v1061_v38 }
 0x236   : > { %1451 = shalt.err (!%p1448_p7)
}
 0x237   : > { %s1452_s29 = scalar_lea.hbm %s1923_s27, 16  ;;  %s1456_s16 = scalar_lea.hbm %s1984_s5, 32 }
 0x238   : > { %p1453_p8 = scmp.ne.s32.totalorder %s1923_s27, %s1452_s29  ;;  %p1457_p12 = scmp.lt.u32.totalorder %s1923_s27, %s1984_s5 }
 0x239   : > { %p1458_p13 = scmp.lt.u32.totalorder %s1456_s16, %s1452_s29  ;;  %p1460_p1 = scmp.lt.u32.totalorder %s1452_s29, %s1923_s27 }
 0x23a   : > { %p1454_p10 = pnand %p1453_p8, %p1617_p3 }
 0x23b   : > { %p1459_p0 = por %p1458_p13, %p1457_p12 }
 0x23c   : > { %p1455_p11 = pneg %p1454_p10 }
 0x23d   : > { %p1461_p2 = por %p1460_p1, %p1459_p0 }
 0x23f   : > { %p1462_p4 = pnand %p1461_p2, %p1455_p11 }
 0x241   : > { %1465 = shalt.err (!%p1462_p4)
}
 0x242   : > { %1318 = dma.vmem_to_hbm [thread:$0]  (%p1617_p3), %s1925_s15, 16, %s1923_s27, %s1065_s7  }
 0x243 PF: > { %p1324_p5 = scmp.ge.s32.totalorder %s1532_s25, 2  ;;  %s1089_s21 = sand.u32 1, %s1504_s18  }
 0x244   : > { %s1090_s17 = scalar_lea.sflag [#allocation3], %s1089_s21 }
 0x245   : > { %p1321_p6 = pnand %p1324_p5, %p1627_p9 }
 0x247   : > { %1499 = dma.done.wait (!%p1321_p6), %s1090_s17, 16  }
 0x248   : > { %1501 = vsyncadd (!%p1321_p6), %s1090_s17, 4294967280  ;;  %s18_s25 = sadd.s32 1, %s1532_s25   ;;  %s1989_s30 = sld [smem:[#allocation5_spill]] }
 0x249   : > { %p15_p7 = scmp.ge.s32.totalorder %s18_s25, 6   ;;  %s1990_s18 = smov %s1508_s19 }
 0x24a   : > { %s1991_s19 = smov %s1512_s20  ;;  %s1992_s20 = smov %s1635_s9 }
 0x24b   : > { %s1993_s21 = smov %s1524_s23  ;;  %s1994_s22 = smov %s1528_s24 }
 0x24c   : > { %s1995_s23 = smov %s1998_s28  ;;  %17 = sbr.rel (!%p15_p7) target bundleno = 5 (0x5), region = 82 }
 0x24e   : > { %s1996_s24 = smov %s1989_s30 }
 0x253   :  { %1094 = vsyncpa [#allocation3], 1 }
 0x254   :  { %1096 = vsyncpa [#allocation3 + $0x1], 1 }

</bundles_post_ra>
